<compile_context>
chip_gen: v7x
topology: tpu7x:2x2x1
jax: 0.10.0
libtpu: 0.0.40
codegen_flags: <defaults>
</compile_context>

<pallas_src>
import jax
import jax.numpy as jnp
from jax.experimental import pallas as pl
from jax.experimental.pallas import tpu as pltpu

_EPS = 1e-5


def _double_conv_kernel(x_ref, t1_ref, t2_ref, g1_ref, b1_ref, g2_ref, b2_ref,
                        sel_ref, selt_ref, out_ref, pad_ref):
  # x_ref   : (N, H+2, W*Cin)   f32  input, H zero-padded, (W, Cin) lane-folded
  # t1_ref  : (3, W*Cin,  W*Cout) bf16  banded conv1 weights (one band per dy)
  # t2_ref  : (3, W*Cout, W*Cout) bf16  banded conv2 weights
  # g*/b*   : (1, Cout) f32            BN affine params
  # sel_ref : (W*Cout, Cout) f32       one-hot lane -> channel reducer
  # selt_ref: (Cout, W*Cout) f32       its transpose (channel -> lane broadcast)
  # out_ref : (N, H, W*Cout) f32
  # pad_ref : (N, H+2, W*Cout) f32     scratch: conv2 input with H halo
  N, Hp, WCi = x_ref.shape
  H = Hp - 2
  WC = out_ref.shape[-1]
  Cout = g1_ref.shape[-1]
  M = N * H
  inv_count = 1.0 / float(M * (WC // Cout))   # 1 / (N*H*W)

  def band_conv(load_lhs, t_ref):
    acc = jnp.zeros((M, t_ref.shape[-1]), jnp.float32)
    for dy in range(3):                        # 3 lane-dense MXU matmuls
      acc += jnp.dot(load_lhs(dy), t_ref[dy],
                     preferred_element_type=jnp.float32)
    return acc

  def bn_relu(acc, g_ref, b_ref):
    # Training-mode batch norm: one pass for sum & sum-of-squares, per-channel
    # reduction via the one-hot selector, fused scale/shift + ReLU.
    col_s = jnp.sum(acc, axis=0, keepdims=True)            # (1, WC)
    col_q = jnp.sum(acc * acc, axis=0, keepdims=True)      # (1, WC)
    ch_s = jnp.dot(col_s, sel_ref[...], preferred_element_type=jnp.float32)
    ch_q = jnp.dot(col_q, sel_ref[...], preferred_element_type=jnp.float32)
    mean = ch_s * inv_count                                # (1, Cout)
    var = jnp.maximum(ch_q * inv_count - mean * mean, 0.0)
    scale = g_ref[...] * jax.lax.rsqrt(var + _EPS)         # (1, Cout)
    shift = b_ref[...] - mean * scale
    scale_v = jnp.dot(scale, selt_ref[...], preferred_element_type=jnp.float32)
    shift_v = jnp.dot(shift, selt_ref[...], preferred_element_type=jnp.float32)
    return jnp.maximum(acc * scale_v + shift_v, 0.0)       # (M, WC) f32

  # ---- conv1 + BN1 + ReLU ----
  def lhs1(dy):
    return x_ref[:, dy:dy + H, :].reshape(M, WCi).astype(jnp.bfloat16)
  y1 = bn_relu(band_conv(lhs1, t1_ref), g1_ref, b1_ref)    # (M, WC)

  # ---- H halo for conv2: zero only the two halo rows, write interior once ----
  pad_ref[:, 0:1, :] = jnp.zeros((N, 1, WC), jnp.float32)
  pad_ref[:, Hp - 1:Hp, :] = jnp.zeros((N, 1, WC), jnp.float32)
  pad_ref[:, 1:H + 1, :] = y1.reshape(N, H, WC)

  # ---- conv2 + BN2 + ReLU (shifted windows read straight from the ref) ----
  def lhs2(dy):
    return pad_ref[:, dy:dy + H, :].reshape(M, WC).astype(jnp.bfloat16)
  y2 = bn_relu(band_conv(lhs2, t2_ref), g2_ref, b2_ref)

  out_ref[...] = y2.reshape(N, H, WC).astype(out_ref.dtype)   # lane-dense store


def _band_weights(w_hwio, W):
  """(3, 3, Ci, Co) HWIO conv weight -> (3, W*Ci, W*Co) banded matrices.

  band[dy, wi*Ci+ci, wo*Co+co] = w[dy, wi-wo+1, ci, co] when 0 <= wi-wo+1 < 3,
  else 0 -- the dx shifts and the width-1 zero padding are folded into the
  band structure, so each conv is 3 lane-dense matmuls instead of 9 tiny ones.
  """
  kh, kw, Ci, Co = w_hwio.shape
  wi = jnp.arange(W)[:, None]
  wo = jnp.arange(W)[None, :]
  dx = wi - wo + 1                                    # (W, W)
  valid = (dx >= 0) & (dx < kw)
  blocks = w_hwio[:, jnp.clip(dx, 0, kw - 1)]         # (3, W, W, Ci, Co)
  blocks = jnp.where(valid[None, :, :, None, None], blocks, 0.0)
  return blocks.transpose(0, 1, 3, 2, 4).reshape(kh, W * Ci, W * Co)


@jax.jit
def double_conv(x_nchw, w1, w2, g1, b1, g2, b2):
  """DoubleConv forward. x_nchw: (N, Cin, H, W); w1/w2 in HWIO (3,3,Ci,Co)."""
  N, Cin, H, W = x_nchw.shape
  Cout = w1.shape[-1]
  WC = W * Cout

  # NCHW -> NHWC, pad H by 1 (W padding is folded into the band weights),
  # fold (W, Cin) onto the lane axis.
  x_nhwc = jnp.transpose(x_nchw, (0, 2, 3, 1)).astype(jnp.float32)
  x2 = jnp.pad(x_nhwc, ((0, 0), (1, 1), (0, 0), (0, 0))).reshape(
      N, H + 2, W * Cin)

  t1 = _band_weights(w1.astype(jnp.float32), W).astype(jnp.bfloat16)
  t2 = _band_weights(w2.astype(jnp.float32), W).astype(jnp.bfloat16)
  sel = jnp.tile(jnp.eye(Cout, dtype=jnp.float32), (W, 1))   # (W*Cout, Cout)
  selt = jnp.transpose(sel)                                   # (Cout, W*Cout)

  out2 = pl.pallas_call(
      _double_conv_kernel,
      out_shape=jax.ShapeDtypeStruct((N, H, WC), jnp.float32),
      in_specs=[pl.BlockSpec(memory_space=pltpu.MemorySpace.VMEM)] * 9,
      out_specs=pl.BlockSpec(memory_space=pltpu.MemorySpace.VMEM),
      scratch_shapes=[pltpu.VMEM((N, H + 2, WC), jnp.float32)],
      compiler_params=pltpu.CompilerParams(
          vmem_limit_bytes=32 * 1024 * 1024),
  )(x2, t1, t2,
    g1.reshape(1, Cout), b1.reshape(1, Cout),
    g2.reshape(1, Cout), b2.reshape(1, Cout),
    sel, selt)

  # (N, H, W*Cout) -> NCHW
  return jnp.transpose(out2.reshape(N, H, W, Cout), (0, 3, 1, 2))


def _reference(x_nchw, w1, w2, g1, b1, g2, b2):
  """Pure-JAX reference (lax.conv + training-mode BN + ReLU)."""
  def conv(x, w):
    return jax.lax.conv_general_dilated(
        x, w, window_strides=(1, 1), padding=((1, 1), (1, 1)),
        dimension_numbers=('NCHW', 'HWIO', 'NCHW'))

  def bn_relu(x, g, b):
    mean = x.mean(axis=(0, 2, 3), keepdims=True)
    var = ((x - mean) ** 2).mean(axis=(0, 2, 3), keepdims=True)
    y = (x - mean) * jax.lax.rsqrt(var + _EPS)
    y = y * g.reshape(1, -1, 1, 1) + b.reshape(1, -1, 1, 1)
    return jnp.maximum(y, 0.0)

  y = bn_relu(conv(x_nchw, w1), g1, b1)
  return bn_relu(conv(y, w2), g2, b2)


if __name__ == "__main__":
  # Small shapes consistent with DoubleConv(in_channels=4, out_channels=8, ...)
  N, Cin, Cout, H, W = 2, 4, 8, 16, 16

  key = jax.random.PRNGKey(0)
  kx, kw1, kw2, kg1, kb1, kg2, kb2 = jax.random.split(key, 7)

  x = jax.random.normal(kx, (N, Cin, H, W), jnp.float32)
  # Conv weights (HWIO layout: (kh, kw, Cin, Cout)); synthetic deterministic
  # params generated directly in HWIO.
  w1 = 0.1 * jax.random.normal(kw1, (3, 3, Cin, Cout), jnp.float32)
  w2 = 0.1 * jax.random.normal(kw2, (3, 3, Cout, Cout), jnp.float32)
  # BatchNorm affine params (PyTorch default gamma=1, beta=0; randomized here
  # to exercise the path).
  g1 = 1.0 + 0.1 * jax.random.normal(kg1, (Cout,), jnp.float32)
  b1 = 0.1 * jax.random.normal(kb1, (Cout,), jnp.float32)
  g2 = 1.0 + 0.1 * jax.random.normal(kg2, (Cout,), jnp.float32)
  b2 = 0.1 * jax.random.normal(kb2, (Cout,), jnp.float32)

  out = double_conv(x, w1, w2, g1, b1, g2, b2)
  out = jax.block_until_ready(out)

  ref = _reference(x, w1, w2, g1, b1, g2, b2)
  max_err = float(jnp.max(jnp.abs(out - ref)))
  assert out.shape == (N, Cout, H, W), out.shape
  # bf16 MXU operands (f32 accumulation) through two conv+BN stages give
  # ~1e-2-scale worst-case error vs the all-f32 reference.
  assert jnp.allclose(out, ref, rtol=5e-2, atol=5e-2), max_err
  print("KERNEL_OK")
</pallas_src>

<mosaic_0001>
module attributes {stable_mosaic.version = 11 : i64} {
  func.func @_double_conv_kernel(%arg0: memref<2x18x64xf32, #tpu.memory_space<vmem>>, %arg1: memref<3x64x128xbf16, #tpu.memory_space<vmem>>, %arg2: memref<3x128x128xbf16, #tpu.memory_space<vmem>>, %arg3: memref<1x8xf32, #tpu.memory_space<vmem>>, %arg4: memref<1x8xf32, #tpu.memory_space<vmem>>, %arg5: memref<1x8xf32, #tpu.memory_space<vmem>>, %arg6: memref<1x8xf32, #tpu.memory_space<vmem>>, %arg7: memref<128x8xf32, #tpu.memory_space<vmem>>, %arg8: memref<8x128xf32, #tpu.memory_space<vmem>>, %arg9: memref<2x16x128xf32, #tpu.memory_space<vmem>>, %arg10: memref<2x18x128xf32, #tpu.memory_space<vmem>>) attributes {dimension_semantics = [], scalar_prefetch = 0 : i64, scratch_operands = 1 : i64, tpu.core_type = #tpu.core_type<tc>} {
    %cst = arith.constant 0.000000e+00 : f32
    %0 = vector.broadcast %cst : f32 to vector<32x128xf32>
    %c0 = arith.constant 0 : index
    %c0_0 = arith.constant 0 : index
    %c0_1 = arith.constant 0 : index
    %1 = vector.load %arg0[%c0, %c0_0, %c0_1] : memref<2x18x64xf32, #tpu.memory_space<vmem>>, vector<2x16x64xf32>
    %2 = vector.shape_cast %1 : vector<2x16x64xf32> to vector<32x64xf32>
    %3 = arith.truncf %2 : vector<32x64xf32> to vector<32x64xbf16>
    %c0_2 = arith.constant 0 : index
    %c0_3 = arith.constant 0 : index
    %c0_4 = arith.constant 0 : index
    %4 = vector.load %arg1[%c0_2, %c0_3, %c0_4] : memref<3x64x128xbf16, #tpu.memory_space<vmem>>, vector<1x64x128xbf16>
    %5 = vector.shape_cast %4 : vector<1x64x128xbf16> to vector<64x128xbf16>
    %cst_5 = arith.constant dense<0.000000e+00> : vector<32x128xf32>
    %6 = tpu.matmul %3, %5, %cst_5 {dimension_numbers = #tpu.dot_dimension_numbers<[1], [0], [0], [1], [0, 0, 1, 1], [], []>} : vector<32x64xbf16>, vector<64x128xbf16>, vector<32x128xf32> -> vector<32x128xf32>
    %7 = arith.addf %0, %6 : vector<32x128xf32>
    %c0_6 = arith.constant 0 : index
    %c1 = arith.constant 1 : index
    %c0_7 = arith.constant 0 : index
    %8 = vector.load %arg0[%c0_6, %c1, %c0_7] : memref<2x18x64xf32, #tpu.memory_space<vmem>>, vector<2x16x64xf32>
    %9 = vector.shape_cast %8 : vector<2x16x64xf32> to vector<32x64xf32>
    %10 = arith.truncf %9 : vector<32x64xf32> to vector<32x64xbf16>
    %c1_8 = arith.constant 1 : index
    %c0_9 = arith.constant 0 : index
    %c0_10 = arith.constant 0 : index
    %11 = vector.load %arg1[%c1_8, %c0_9, %c0_10] : memref<3x64x128xbf16, #tpu.memory_space<vmem>>, vector<1x64x128xbf16>
    %12 = vector.shape_cast %11 : vector<1x64x128xbf16> to vector<64x128xbf16>
    %cst_11 = arith.constant dense<0.000000e+00> : vector<32x128xf32>
    %13 = tpu.matmul %10, %12, %cst_11 {dimension_numbers = #tpu.dot_dimension_numbers<[1], [0], [0], [1], [0, 0, 1, 1], [], []>} : vector<32x64xbf16>, vector<64x128xbf16>, vector<32x128xf32> -> vector<32x128xf32>
    %14 = arith.addf %7, %13 : vector<32x128xf32>
    %c0_12 = arith.constant 0 : index
    %c2 = arith.constant 2 : index
    %c0_13 = arith.constant 0 : index
    %15 = vector.load %arg0[%c0_12, %c2, %c0_13] : memref<2x18x64xf32, #tpu.memory_space<vmem>>, vector<2x16x64xf32>
    %16 = vector.shape_cast %15 : vector<2x16x64xf32> to vector<32x64xf32>
    %17 = arith.truncf %16 : vector<32x64xf32> to vector<32x64xbf16>
    %c2_14 = arith.constant 2 : index
    %c0_15 = arith.constant 0 : index
    %c0_16 = arith.constant 0 : index
    %18 = vector.load %arg1[%c2_14, %c0_15, %c0_16] : memref<3x64x128xbf16, #tpu.memory_space<vmem>>, vector<1x64x128xbf16>
    %19 = vector.shape_cast %18 : vector<1x64x128xbf16> to vector<64x128xbf16>
    %cst_17 = arith.constant dense<0.000000e+00> : vector<32x128xf32>
    %20 = tpu.matmul %17, %19, %cst_17 {dimension_numbers = #tpu.dot_dimension_numbers<[1], [0], [0], [1], [0, 0, 1, 1], [], []>} : vector<32x64xbf16>, vector<64x128xbf16>, vector<32x128xf32> -> vector<32x128xf32>
    %21 = arith.addf %14, %20 : vector<32x128xf32>
    %cst_18 = arith.constant dense<0.000000e+00> : vector<128xf32>
    %22 = vector.multi_reduction <add>, %21, %cst_18 [0] : vector<32x128xf32> to vector<128xf32>
    %23 = vector.shape_cast %22 : vector<128xf32> to vector<1x128xf32>
    %24 = arith.mulf %21, %21 : vector<32x128xf32>
    %cst_19 = arith.constant dense<0.000000e+00> : vector<128xf32>
    %25 = vector.multi_reduction <add>, %24, %cst_19 [0] : vector<32x128xf32> to vector<128xf32>
    %26 = vector.shape_cast %25 : vector<128xf32> to vector<1x128xf32>
    %c0_20 = arith.constant 0 : index
    %c0_21 = arith.constant 0 : index
    %27 = vector.load %arg7[%c0_20, %c0_21] : memref<128x8xf32, #tpu.memory_space<vmem>>, vector<128x8xf32>
    %cst_22 = arith.constant dense<0.000000e+00> : vector<1x8xf32>
    %28 = tpu.matmul %23, %27, %cst_22 {dimension_numbers = #tpu.dot_dimension_numbers<[1], [0], [0], [1], [0, 0, 1, 1], [], []>} : vector<1x128xf32>, vector<128x8xf32>, vector<1x8xf32> -> vector<1x8xf32>
    %c0_23 = arith.constant 0 : index
    %c0_24 = arith.constant 0 : index
    %29 = vector.load %arg7[%c0_23, %c0_24] : memref<128x8xf32, #tpu.memory_space<vmem>>, vector<128x8xf32>
    %cst_25 = arith.constant dense<0.000000e+00> : vector<1x8xf32>
    %30 = tpu.matmul %26, %29, %cst_25 {dimension_numbers = #tpu.dot_dimension_numbers<[1], [0], [0], [1], [0, 0, 1, 1], [], []>} : vector<1x128xf32>, vector<128x8xf32>, vector<1x8xf32> -> vector<1x8xf32>
    %cst_26 = arith.constant 0.001953125 : f32
    %31 = vector.broadcast %cst_26 : f32 to vector<1x8xf32>
    %32 = arith.mulf %28, %31 : vector<1x8xf32>
    %cst_27 = arith.constant 0.001953125 : f32
    %33 = vector.broadcast %cst_27 : f32 to vector<1x8xf32>
    %34 = arith.mulf %30, %33 : vector<1x8xf32>
    %35 = arith.mulf %32, %32 : vector<1x8xf32>
    %36 = arith.subf %34, %35 : vector<1x8xf32>
    %cst_28 = arith.constant 0.000000e+00 : f32
    %37 = vector.broadcast %cst_28 : f32 to vector<1x8xf32>
    %38 = arith.maximumf %36, %37 : vector<1x8xf32>
    %c0_29 = arith.constant 0 : index
    %c0_30 = arith.constant 0 : index
    %39 = vector.load %arg3[%c0_29, %c0_30] : memref<1x8xf32, #tpu.memory_space<vmem>>, vector<1x8xf32>
    %cst_31 = arith.constant 9.99999974E-6 : f32
    %40 = vector.broadcast %cst_31 : f32 to vector<1x8xf32>
    %41 = arith.addf %38, %40 : vector<1x8xf32>
    %42 = math.rsqrt %41 : vector<1x8xf32>
    %43 = arith.mulf %39, %42 : vector<1x8xf32>
    %c0_32 = arith.constant 0 : index
    %c0_33 = arith.constant 0 : index
    %44 = vector.load %arg4[%c0_32, %c0_33] : memref<1x8xf32, #tpu.memory_space<vmem>>, vector<1x8xf32>
    %45 = arith.mulf %32, %43 : vector<1x8xf32>
    %46 = arith.subf %44, %45 : vector<1x8xf32>
    %c0_34 = arith.constant 0 : index
    %c0_35 = arith.constant 0 : index
    %47 = vector.load %arg8[%c0_34, %c0_35] : memref<8x128xf32, #tpu.memory_space<vmem>>, vector<8x128xf32>
    %cst_36 = arith.constant dense<0.000000e+00> : vector<1x128xf32>
    %48 = tpu.matmul %43, %47, %cst_36 {dimension_numbers = #tpu.dot_dimension_numbers<[1], [0], [0], [1], [0, 0, 1, 1], [], []>} : vector<1x8xf32>, vector<8x128xf32>, vector<1x128xf32> -> vector<1x128xf32>
    %c0_37 = arith.constant 0 : index
    %c0_38 = arith.constant 0 : index
    %49 = vector.load %arg8[%c0_37, %c0_38] : memref<8x128xf32, #tpu.memory_space<vmem>>, vector<8x128xf32>
    %cst_39 = arith.constant dense<0.000000e+00> : vector<1x128xf32>
    %50 = tpu.matmul %46, %49, %cst_39 {dimension_numbers = #tpu.dot_dimension_numbers<[1], [0], [0], [1], [0, 0, 1, 1], [], []>} : vector<1x8xf32>, vector<8x128xf32>, vector<1x128xf32> -> vector<1x128xf32>
    %51 = vector.broadcast %48 : vector<1x128xf32> to vector<32x128xf32>
    %52 = arith.mulf %21, %51 : vector<32x128xf32>
    %53 = vector.broadcast %50 : vector<1x128xf32> to vector<32x128xf32>
    %54 = arith.addf %52, %53 : vector<32x128xf32>
    %cst_40 = arith.constant 0.000000e+00 : f32
    %55 = vector.broadcast %cst_40 : f32 to vector<32x128xf32>
    %56 = arith.maximumf %54, %55 : vector<32x128xf32>
    %cst_41 = arith.constant 0.000000e+00 : f32
    %57 = vector.broadcast %cst_41 : f32 to vector<2x1x128xf32>
    %c0_42 = arith.constant 0 : index
    %c0_43 = arith.constant 0 : index
    %c0_44 = arith.constant 0 : index
    %58 = vector.load %arg10[%c0_42, %c0_43, %c0_44] : memref<2x18x128xf32, #tpu.memory_space<vmem>>, vector<2x1x128xf32>
    tpu.vector_store %arg10[%c0_42, %c0_43, %c0_44], %57 {strides = array<i32>} : memref<2x18x128xf32, #tpu.memory_space<vmem>>, vector<2x1x128xf32>,
    %cst_45 = arith.constant 0.000000e+00 : f32
    %59 = vector.broadcast %cst_45 : f32 to vector<2x1x128xf32>
    %c0_46 = arith.constant 0 : index
    %c17 = arith.constant 17 : index
    %c0_47 = arith.constant 0 : index
    %60 = vector.load %arg10[%c0_46, %c17, %c0_47] : memref<2x18x128xf32, #tpu.memory_space<vmem>>, vector<2x1x128xf32>
    tpu.vector_store %arg10[%c0_46, %c17, %c0_47], %59 {strides = array<i32>} : memref<2x18x128xf32, #tpu.memory_space<vmem>>, vector<2x1x128xf32>,
    %61 = vector.shape_cast %56 : vector<32x128xf32> to vector<2x16x128xf32>
    %c0_48 = arith.constant 0 : index
    %c1_49 = arith.constant 1 : index
    %c0_50 = arith.constant 0 : index
    %62 = vector.load %arg10[%c0_48, %c1_49, %c0_50] : memref<2x18x128xf32, #tpu.memory_space<vmem>>, vector<2x16x128xf32>
    tpu.vector_store %arg10[%c0_48, %c1_49, %c0_50], %61 {strides = array<i32>} : memref<2x18x128xf32, #tpu.memory_space<vmem>>, vector<2x16x128xf32>,
    %cst_51 = arith.constant 0.000000e+00 : f32
    %63 = vector.broadcast %cst_51 : f32 to vector<32x128xf32>
    %c0_52 = arith.constant 0 : index
    %c0_53 = arith.constant 0 : index
    %c0_54 = arith.constant 0 : index
    %64 = vector.load %arg10[%c0_52, %c0_53, %c0_54] : memref<2x18x128xf32, #tpu.memory_space<vmem>>, vector<2x16x128xf32>
    %65 = vector.shape_cast %64 : vector<2x16x128xf32> to vector<32x128xf32>
    %66 = arith.truncf %65 : vector<32x128xf32> to vector<32x128xbf16>
    %c0_55 = arith.constant 0 : index
    %c0_56 = arith.constant 0 : index
    %c0_57 = arith.constant 0 : index
    %67 = vector.load %arg2[%c0_55, %c0_56, %c0_57] : memref<3x128x128xbf16, #tpu.memory_space<vmem>>, vector<1x128x128xbf16>
    %68 = vector.shape_cast %67 : vector<1x128x128xbf16> to vector<128x128xbf16>
    %cst_58 = arith.constant dense<0.000000e+00> : vector<32x128xf32>
    %69 = tpu.matmul %66, %68, %cst_58 {dimension_numbers = #tpu.dot_dimension_numbers<[1], [0], [0], [1], [0, 0, 1, 1], [], []>} : vector<32x128xbf16>, vector<128x128xbf16>, vector<32x128xf32> -> vector<32x128xf32>
    %70 = arith.addf %63, %69 : vector<32x128xf32>
    %c0_59 = arith.constant 0 : index
    %c1_60 = arith.constant 1 : index
    %c0_61 = arith.constant 0 : index
    %71 = vector.load %arg10[%c0_59, %c1_60, %c0_61] : memref<2x18x128xf32, #tpu.memory_space<vmem>>, vector<2x16x128xf32>
    %72 = vector.shape_cast %71 : vector<2x16x128xf32> to vector<32x128xf32>
    %73 = arith.truncf %72 : vector<32x128xf32> to vector<32x128xbf16>
    %c1_62 = arith.constant 1 : index
    %c0_63 = arith.constant 0 : index
    %c0_64 = arith.constant 0 : index
    %74 = vector.load %arg2[%c1_62, %c0_63, %c0_64] : memref<3x128x128xbf16, #tpu.memory_space<vmem>>, vector<1x128x128xbf16>
    %75 = vector.shape_cast %74 : vector<1x128x128xbf16> to vector<128x128xbf16>
    %cst_65 = arith.constant dense<0.000000e+00> : vector<32x128xf32>
    %76 = tpu.matmul %73, %75, %cst_65 {dimension_numbers = #tpu.dot_dimension_numbers<[1], [0], [0], [1], [0, 0, 1, 1], [], []>} : vector<32x128xbf16>, vector<128x128xbf16>, vector<32x128xf32> -> vector<32x128xf32>
    %77 = arith.addf %70, %76 : vector<32x128xf32>
    %c0_66 = arith.constant 0 : index
    %c2_67 = arith.constant 2 : index
    %c0_68 = arith.constant 0 : index
    %78 = vector.load %arg10[%c0_66, %c2_67, %c0_68] : memref<2x18x128xf32, #tpu.memory_space<vmem>>, vector<2x16x128xf32>
    %79 = vector.shape_cast %78 : vector<2x16x128xf32> to vector<32x128xf32>
    %80 = arith.truncf %79 : vector<32x128xf32> to vector<32x128xbf16>
    %c2_69 = arith.constant 2 : index
    %c0_70 = arith.constant 0 : index
    %c0_71 = arith.constant 0 : index
    %81 = vector.load %arg2[%c2_69, %c0_70, %c0_71] : memref<3x128x128xbf16, #tpu.memory_space<vmem>>, vector<1x128x128xbf16>
    %82 = vector.shape_cast %81 : vector<1x128x128xbf16> to vector<128x128xbf16>
    %cst_72 = arith.constant dense<0.000000e+00> : vector<32x128xf32>
    %83 = tpu.matmul %80, %82, %cst_72 {dimension_numbers = #tpu.dot_dimension_numbers<[1], [0], [0], [1], [0, 0, 1, 1], [], []>} : vector<32x128xbf16>, vector<128x128xbf16>, vector<32x128xf32> -> vector<32x128xf32>
    %84 = arith.addf %77, %83 : vector<32x128xf32>
    %cst_73 = arith.constant dense<0.000000e+00> : vector<128xf32>
    %85 = vector.multi_reduction <add>, %84, %cst_73 [0] : vector<32x128xf32> to vector<128xf32>
    %86 = vector.shape_cast %85 : vector<128xf32> to vector<1x128xf32>
    %87 = arith.mulf %84, %84 : vector<32x128xf32>
    %cst_74 = arith.constant dense<0.000000e+00> : vector<128xf32>
    %88 = vector.multi_reduction <add>, %87, %cst_74 [0] : vector<32x128xf32> to vector<128xf32>
    %89 = vector.shape_cast %88 : vector<128xf32> to vector<1x128xf32>
    %c0_75 = arith.constant 0 : index
    %c0_76 = arith.constant 0 : index
    %90 = vector.load %arg7[%c0_75, %c0_76] : memref<128x8xf32, #tpu.memory_space<vmem>>, vector<128x8xf32>
    %cst_77 = arith.constant dense<0.000000e+00> : vector<1x8xf32>
    %91 = tpu.matmul %86, %90, %cst_77 {dimension_numbers = #tpu.dot_dimension_numbers<[1], [0], [0], [1], [0, 0, 1, 1], [], []>} : vector<1x128xf32>, vector<128x8xf32>, vector<1x8xf32> -> vector<1x8xf32>
    %c0_78 = arith.constant 0 : index
    %c0_79 = arith.constant 0 : index
    %92 = vector.load %arg7[%c0_78, %c0_79] : memref<128x8xf32, #tpu.memory_space<vmem>>, vector<128x8xf32>
    %cst_80 = arith.constant dense<0.000000e+00> : vector<1x8xf32>
    %93 = tpu.matmul %89, %92, %cst_80 {dimension_numbers = #tpu.dot_dimension_numbers<[1], [0], [0], [1], [0, 0, 1, 1], [], []>} : vector<1x128xf32>, vector<128x8xf32>, vector<1x8xf32> -> vector<1x8xf32>
    %cst_81 = arith.constant 0.001953125 : f32
    %94 = vector.broadcast %cst_81 : f32 to vector<1x8xf32>
    %95 = arith.mulf %91, %94 : vector<1x8xf32>
    %cst_82 = arith.constant 0.001953125 : f32
    %96 = vector.broadcast %cst_82 : f32 to vector<1x8xf32>
    %97 = arith.mulf %93, %96 : vector<1x8xf32>
    %98 = arith.mulf %95, %95 : vector<1x8xf32>
    %99 = arith.subf %97, %98 : vector<1x8xf32>
    %cst_83 = arith.constant 0.000000e+00 : f32
    %100 = vector.broadcast %cst_83 : f32 to vector<1x8xf32>
    %101 = arith.maximumf %99, %100 : vector<1x8xf32>
    %c0_84 = arith.constant 0 : index
    %c0_85 = arith.constant 0 : index
    %102 = vector.load %arg5[%c0_84, %c0_85] : memref<1x8xf32, #tpu.memory_space<vmem>>, vector<1x8xf32>
    %cst_86 = arith.constant 9.99999974E-6 : f32
    %103 = vector.broadcast %cst_86 : f32 to vector<1x8xf32>
    %104 = arith.addf %101, %103 : vector<1x8xf32>
    %105 = math.rsqrt %104 : vector<1x8xf32>
    %106 = arith.mulf %102, %105 : vector<1x8xf32>
    %c0_87 = arith.constant 0 : index
    %c0_88 = arith.constant 0 : index
    %107 = vector.load %arg6[%c0_87, %c0_88] : memref<1x8xf32, #tpu.memory_space<vmem>>, vector<1x8xf32>
    %108 = arith.mulf %95, %106 : vector<1x8xf32>
    %109 = arith.subf %107, %108 : vector<1x8xf32>
    %c0_89 = arith.constant 0 : index
    %c0_90 = arith.constant 0 : index
    %110 = vector.load %arg8[%c0_89, %c0_90] : memref<8x128xf32, #tpu.memory_space<vmem>>, vector<8x128xf32>
    %cst_91 = arith.constant dense<0.000000e+00> : vector<1x128xf32>
    %111 = tpu.matmul %106, %110, %cst_91 {dimension_numbers = #tpu.dot_dimension_numbers<[1], [0], [0], [1], [0, 0, 1, 1], [], []>} : vector<1x8xf32>, vector<8x128xf32>, vector<1x128xf32> -> vector<1x128xf32>
    %c0_92 = arith.constant 0 : index
    %c0_93 = arith.constant 0 : index
    %112 = vector.load %arg8[%c0_92, %c0_93] : memref<8x128xf32, #tpu.memory_space<vmem>>, vector<8x128xf32>
    %cst_94 = arith.constant dense<0.000000e+00> : vector<1x128xf32>
    %113 = tpu.matmul %109, %112, %cst_94 {dimension_numbers = #tpu.dot_dimension_numbers<[1], [0], [0], [1], [0, 0, 1, 1], [], []>} : vector<1x8xf32>, vector<8x128xf32>, vector<1x128xf32> -> vector<1x128xf32>
    %114 = vector.broadcast %111 : vector<1x128xf32> to vector<32x128xf32>
    %115 = arith.mulf %84, %114 : vector<32x128xf32>
    %116 = vector.broadcast %113 : vector<1x128xf32> to vector<32x128xf32>
    %117 = arith.addf %115, %116 : vector<32x128xf32>
    %cst_95 = arith.constant 0.000000e+00 : f32
    %118 = vector.broadcast %cst_95 : f32 to vector<32x128xf32>
    %119 = arith.maximumf %117, %118 : vector<32x128xf32>
    %120 = vector.shape_cast %119 : vector<32x128xf32> to vector<2x16x128xf32>
    %c0_96 = arith.constant 0 : index
    %c0_97 = arith.constant 0 : index
    %c0_98 = arith.constant 0 : index
    %121 = vector.load %arg9[%c0_96, %c0_97, %c0_98] : memref<2x16x128xf32, #tpu.memory_space<vmem>>, vector<2x16x128xf32>
    tpu.vector_store %arg9[%c0_96, %c0_97, %c0_98], %120 {strides = array<i32>} : memref<2x16x128xf32, #tpu.memory_space<vmem>>, vector<2x16x128xf32>,
    return
  }
}

</mosaic_0001>

<bundles_post_ra>
// kernel: tile.9
= control target key start
LH: loop header
LB: loop body
LE: loop exit
PB: predicated region body
PF: predicated region fallthrough
CT: control target
= control target key end

     0   :  { %vm6_vm0 = vcmask 1043458   ;;  %vm10_vm1 = vcmask 1045508   ;;  %vm14_vm2 = vcmask 1047558   ;;  %s19_s6 = smov 3  ;;  %s22_s7 = smov 12  ;;  %vm16_vm3 = vcmask 64512   ;;  %s736_s0 = inlined_call_operand.vmem [shape: f32[16,8,8], index: 0, kind: input, shape index: {}]   ;;  %s737_s1 = inlined_call_operand.vmem [shape: f32[128,8], index: 1, kind: output, shape index: {}]  }
   0x1   :  { %v348_v0 = vld [vmem:[%s736_s0 + $0xf] ss:$16 sm:%s19_s6]   ;;  %s27_s12 = smov 48  ;;  %s32_s13 = smov 192  ;;  %vm38_vm4 = vcmask 1048512   ;;  %vm60_vm5 = vcmask 982912  }
   0x2   :  { %v349_v1 = vld [vmem:[%s736_s0 + $0xf] ss:$16 sm:%s22_s7]   ;;  %s63_s18 = smov 3  ;;  %s66_s21 = smov 12  ;;  %vm82_vm6 = vcmask 917312   ;;  %vm104_vm7 = vcmask 851712  }
   0x3   :  { %v25_v2 = vsel %vm6_vm0, %v349_v1, %v348_v0  ;;  %v350_v3 = vld [vmem:[%s736_s0 + $0xf] ss:$16 sm:%s27_s12]   ;;  %v356_v6 = vld [vmem:[%s736_s0 + $0xd] ss:$16 sm:%s63_s18]   ;;  %s71_s22 = smov 48  ;;  %s76_s27 = smov 192 }
   0x4   :  { %v351_v4 = vld [vmem:[%s736_s0 + $0xf] ss:$16 sm:%s32_s13]   ;;  %v30_v5 = vsel %vm10_vm1, %v350_v3, %v25_v2  ;;  %v357_v8 = vld [vmem:[%s736_s0 + $0xd] ss:$16 sm:%s66_s21]   ;;  %s423_s28 = smov 120   ;;  %s41_s2 = smov 3 }
   0x5   :  { %v35_v7 = vsel %vm14_vm2, %v351_v4, %v30_v5  ;;  %v358_v9 = vld [vmem:[%s736_s0 + $0xd] ss:$16 sm:%s71_s22]   ;;  %v69_v10 = vsel %vm6_vm0, %v357_v8, %v356_v6  ;;  %s44_s3 = smov 12  ;;  %v352_v13 = vld [vmem:[%s736_s0 + $0xe] ss:$16 sm:%s41_s2]   ;;  %s49_s8 = smov 48 }
   0x6   :  { %36 = vrot.lane.b32.xlu0 %v35_v7, %s423_s28  ;;  %v359_v11 = vld [vmem:[%s736_s0 + $0xd] ss:$16 sm:%s76_s27]   ;;  %v74_v12 = vsel %vm10_vm1, %v358_v9, %v69_v10  ;;  %s54_s9 = smov 192  ;;  %s85_s14 = smov 3  ;;  %vm126_vm8 = vcmask 786112   ;;  %vm148_vm9 = vcmask 720512  }
   0x7   :  { %v353_v14 = vld [vmem:[%s736_s0 + $0xe] ss:$16 sm:%s44_s3]   ;;  %v79_v15 = vsel %vm14_vm2, %v359_v11, %v74_v12  ;;  %s424_s15 = smov 104   ;;  %v360_v20 = vld [vmem:[%s736_s0 + $0xc] ss:$16 sm:%s85_s14]   ;;  %s88_s18 = smov 12 }
   0x8   :  { %v47_v16 = vsel %vm6_vm0, %v353_v14, %v352_v13  ;;  %v354_v17 = vld [vmem:[%s736_s0 + $0xe] ss:$16 sm:%s49_s8]   ;;  %80 = vrot.lane.b32.xlu1 %v79_v15, %s424_s15  ;;  %s93_s19 = smov 48  ;;  %s98_s24 = smov 192  ;;  %vm170_vm10 = vcmask 654912   ;;  %vm192_vm11 = vcmask 589312  }
   0x9   :  { %v355_v18 = vld [vmem:[%s736_s0 + $0xe] ss:$16 sm:%s54_s9]   ;;  %v52_v19 = vsel %vm10_vm1, %v354_v17, %v47_v16  ;;  %v361_v22 = vld [vmem:[%s736_s0 + $0xc] ss:$16 sm:%s88_s18]   ;;  %s425_s25 = smov 112   ;;  %s107_s28 = smov 3 }
   0xa   :  { %v57_v21 = vsel %vm14_vm2, %v355_v18, %v52_v19  ;;  %v362_v23 = vld [vmem:[%s736_s0 + $0xc] ss:$16 sm:%s93_s19]   ;;  %v91_v24 = vsel %vm6_vm0, %v361_v22, %v360_v20  ;;  %s110_s29 = smov 12  ;;  %v364_v27 = vld [vmem:[%s736_s0 + $0xb] ss:$16 sm:%s107_s28]   ;;  %s115_s5 = smov 48 }
   0xb   :  { %58 = vrot.lane.b32.xlu0 %v57_v21, %s425_s25  ;;  %v363_v25 = vld [vmem:[%s736_s0 + $0xc] ss:$16 sm:%s98_s24]   ;;  %v96_v26 = vsel %vm10_vm1, %v362_v23, %v91_v24  ;;  %s120_s6 = smov 192  ;;  %s129_s11 = smov 3  ;;  %vm214_vm12 = vcmask 523712   ;;  %vm236_vm13 = vcmask 458112  }
   0xc   :  { %v365_v28 = vld [vmem:[%s736_s0 + $0xb] ss:$16 sm:%s110_s29]   ;;  %v101_v29 = vsel %vm14_vm2, %v363_v25, %v96_v26  ;;  %s426_s12 = smov 96   ;;  %v368_v34 = vld [vmem:[%s736_s0 + $0xa] ss:$16 sm:%s129_s11]   ;;  %s132_s15 = smov 12 }
   0xd   :  { %v113_v30 = vsel %vm6_vm0, %v365_v28, %v364_v27  ;;  %v366_v31 = vld [vmem:[%s736_s0 + $0xb] ss:$16 sm:%s115_s5]   ;;  %102 = vrot.lane.b32.xlu1 %v101_v29, %s426_s12  ;;  %s137_s16 = smov 48  ;;  %s142_s21 = smov 192  ;;  %vm258_vm14 = vcmask 392512   ;;  %vm280_vm15 = vcmask 326912  }
   0xe   :  { %v367_v32 = vld [vmem:[%s736_s0 + $0xb] ss:$16 sm:%s120_s6]   ;;  %v118_v33 = vsel %vm10_vm1, %v366_v31, %v113_v30  ;;  %v369_v36 = vld [vmem:[%s736_s0 + $0xa] ss:$16 sm:%s132_s15]   ;;  %s427_s22 = smov 88   ;;  %s151_s25 = smov 3 }
   0xf   :  { %v123_v35 = vsel %vm14_vm2, %v367_v32, %v118_v33  ;;  %v370_v37 = vld [vmem:[%s736_s0 + $0xa] ss:$16 sm:%s137_s16]   ;;  %v135_v38 = vsel %vm6_vm0, %v369_v36, %v368_v34  ;;  %s154_s26 = smov 12  ;;  %v372_v41 = vld [vmem:[%s736_s0 + $0x9] ss:$16 sm:%s151_s25]   ;;  %s159_s2 = smov 48 }
  0x10   :  { %124 = vrot.lane.b32.xlu0 %v123_v35, %s427_s22  ;;  %v371_v39 = vld [vmem:[%s736_s0 + $0xa] ss:$16 sm:%s142_s21]   ;;  %v140_v40 = vsel %vm10_vm1, %v370_v37, %v135_v38  ;;  %s164_s3 = smov 192  ;;  %s173_s8 = smov 3 }
  0x11   :  { %v373_v42 = vld [vmem:[%s736_s0 + $0x9] ss:$16 sm:%s154_s26]   ;;  %v145_v43 = vsel %vm14_vm2, %v371_v39, %v140_v40  ;;  %s428_s9 = smov 80   ;;  %v376_v48 = vld [vmem:[%s736_s0 + $0x8] ss:$16 sm:%s173_s8]   ;;  %s176_s12 = smov 12 }
  0x12   :  { %v157_v44 = vsel %vm6_vm0, %v373_v42, %v372_v41  ;;  %v374_v45 = vld [vmem:[%s736_s0 + $0x9] ss:$16 sm:%s159_s2]   ;;  %146 = vrot.lane.b32.xlu1 %v145_v43, %s428_s9  ;;  %s181_s13 = smov 48  ;;  %s186_s18 = smov 192 }
  0x13   :  { %v375_v46 = vld [vmem:[%s736_s0 + $0x9] ss:$16 sm:%s164_s3]   ;;  %v162_v47 = vsel %vm10_vm1, %v374_v45, %v157_v44  ;;  %v377_v50 = vld [vmem:[%s736_s0 + $0x8] ss:$16 sm:%s176_s12]   ;;  %s429_s19 = smov 72   ;;  %s195_s22 = smov 3 }
  0x14   :  { %v167_v49 = vsel %vm14_vm2, %v375_v46, %v162_v47  ;;  %v378_v51 = vld [vmem:[%s736_s0 + $0x8] ss:$16 sm:%s181_s13]   ;;  %v179_v52 = vsel %vm6_vm0, %v377_v50, %v376_v48  ;;  %s198_s23 = smov 12  ;;  %v380_v55 = vld [vmem:[%s736_s0 + $0x7] ss:$16 sm:%s195_s22]   ;;  %s203_s28 = smov 48 }
  0x15   :  { %168 = vrot.lane.b32.xlu0 %v167_v49, %s429_s19  ;;  %v379_v53 = vld [vmem:[%s736_s0 + $0x8] ss:$16 sm:%s186_s18]   ;;  %v184_v54 = vsel %vm10_vm1, %v378_v51, %v179_v52  ;;  %s208_s29 = smov 192  ;;  %s217_s5 = smov 3 }
  0x16   :  { %v381_v56 = vld [vmem:[%s736_s0 + $0x7] ss:$16 sm:%s198_s23]   ;;  %v189_v57 = vsel %vm14_vm2, %v379_v53, %v184_v54  ;;  %s430_s6 = smov 64   ;;  %v384_v62 = vld [vmem:[%s736_s0 + $0x6] ss:$16 sm:%s217_s5]   ;;  %s220_s9 = smov 12 }
  0x17   :  { %v201_v58 = vsel %vm6_vm0, %v381_v56, %v380_v55  ;;  %v382_v59 = vld [vmem:[%s736_s0 + $0x7] ss:$16 sm:%s203_s28]   ;;  %190 = vrot.lane.b32.xlu1 %v189_v57, %s430_s6  ;;  %s225_s10 = smov 48  ;;  %s230_s15 = smov 192 }
  0x18   :  { %v383_v60 = vld [vmem:[%s736_s0 + $0x7] ss:$16 sm:%s208_s29]   ;;  %v206_v61 = vsel %vm10_vm1, %v382_v59, %v201_v58  ;;  %v385_v0 = vld [vmem:[%s736_s0 + $0x6] ss:$16 sm:%s220_s9]   ;;  %s431_s16 = smov 56   ;;  %s239_s19 = smov 3 }
  0x19   :  { %v211_v63 = vsel %vm14_vm2, %v383_v60, %v206_v61  ;;  %v386_v1 = vld [vmem:[%s736_s0 + $0x6] ss:$16 sm:%s225_s10]   ;;  %v223_v2 = vsel %vm6_vm0, %v385_v0, %v384_v62  ;;  %s242_s20 = smov 12  ;;  %v388_v5 = vld [vmem:[%s736_s0 + $0x5] ss:$16 sm:%s239_s19]   ;;  %s247_s25 = smov 48 }
  0x1a   :  { %212 = vrot.lane.b32.xlu0 %v211_v63, %s431_s16  ;;  %v387_v3 = vld [vmem:[%s736_s0 + $0x6] ss:$16 sm:%s230_s15]   ;;  %v228_v4 = vsel %vm10_vm1, %v386_v1, %v223_v2  ;;  %s252_s26 = smov 192  ;;  %s261_s2 = smov 3 }
  0x1b   :  { %v389_v6 = vld [vmem:[%s736_s0 + $0x5] ss:$16 sm:%s242_s20]   ;;  %v233_v7 = vsel %vm14_vm2, %v387_v3, %v228_v4  ;;  %s432_s3 = smov 48   ;;  %v392_v12 = vld [vmem:[%s736_s0 + $0x4] ss:$16 sm:%s261_s2]   ;;  %s264_s6 = smov 12 }
  0x1c   :  { %v245_v8 = vsel %vm6_vm0, %v389_v6, %v388_v5  ;;  %v390_v9 = vld [vmem:[%s736_s0 + $0x5] ss:$16 sm:%s247_s25]   ;;  %234 = vrot.lane.b32.xlu1 %v233_v7, %s432_s3  ;;  %s269_s7 = smov 48  ;;  %s274_s12 = smov 192 }
  0x1d   :  { %v391_v10 = vld [vmem:[%s736_s0 + $0x5] ss:$16 sm:%s252_s26]   ;;  %v250_v11 = vsel %vm10_vm1, %v390_v9, %v245_v8  ;;  %v393_v14 = vld [vmem:[%s736_s0 + $0x4] ss:$16 sm:%s264_s6]   ;;  %s433_s13 = smov 40   ;;  %s283_s16 = smov 3 }
  0x1e   :  { %v255_v13 = vsel %vm14_vm2, %v391_v10, %v250_v11  ;;  %v394_v15 = vld [vmem:[%s736_s0 + $0x4] ss:$16 sm:%s269_s7]   ;;  %v267_v16 = vsel %vm6_vm0, %v393_v14, %v392_v12  ;;  %s286_s17 = smov 12  ;;  %v396_v19 = vld [vmem:[%s736_s0 + $0x3] ss:$16 sm:%s283_s16]   ;;  %s291_s22 = smov 48 }
  0x1f   :  { %256 = vrot.lane.b32.xlu0 %v255_v13, %s433_s13  ;;  %v395_v17 = vld [vmem:[%s736_s0 + $0x4] ss:$16 sm:%s274_s12]   ;;  %v272_v18 = vsel %vm10_vm1, %v394_v15, %v267_v16  ;;  %s296_s23 = smov 192  ;;  %s305_s28 = smov 3 }
  0x20   :  { %v397_v20 = vld [vmem:[%s736_s0 + $0x3] ss:$16 sm:%s286_s17]   ;;  %v277_v21 = vsel %vm14_vm2, %v395_v17, %v272_v18  ;;  %s434_s29 = smov 32   ;;  %v400_v26 = vld [vmem:[%s736_s0 + $0x2] ss:$16 sm:%s305_s28]   ;;  %s308_s3 = smov 12 }
  0x21   :  { %v289_v22 = vsel %vm6_vm0, %v397_v20, %v396_v19  ;;  %v398_v23 = vld [vmem:[%s736_s0 + $0x3] ss:$16 sm:%s291_s22]   ;;  %278 = vrot.lane.b32.xlu1 %v277_v21, %s434_s29  ;;  %s313_s4 = smov 48  ;;  %s318_s9 = smov 192 }
  0x22   :  { %v399_v24 = vld [vmem:[%s736_s0 + $0x3] ss:$16 sm:%s296_s23]   ;;  %v294_v25 = vsel %vm10_vm1, %v398_v23, %v289_v22  ;;  %v401_v28 = vld [vmem:[%s736_s0 + $0x2] ss:$16 sm:%s308_s3]   ;;  %s435_s10 = smov 24   ;;  %s327_s13 = smov 3 }
  0x23   :  { %v299_v27 = vsel %vm14_vm2, %v399_v24, %v294_v25  ;;  %v402_v29 = vld [vmem:[%s736_s0 + $0x2] ss:$16 sm:%s313_s4]   ;;  %v311_v30 = vsel %vm6_vm0, %v401_v28, %v400_v26  ;;  %s330_s14 = smov 12  ;;  %v404_v33 = vld [vmem:[%s736_s0 + $0x1] ss:$16 sm:%s327_s13]   ;;  %s335_s19 = smov 48 }
  0x24   :  { %300 = vrot.lane.b32.xlu0 %v299_v27, %s435_s10  ;;  %v403_v31 = vld [vmem:[%s736_s0 + $0x2] ss:$16 sm:%s318_s9]   ;;  %v316_v32 = vsel %vm10_vm1, %v402_v29, %v311_v30  ;;  %s340_s20 = smov 192  ;;  %s2_s25 = smov 3 }
  0x25   :  { %v405_v34 = vld [vmem:[%s736_s0 + $0x1] ss:$16 sm:%s330_s14]   ;;  %v321_v35 = vsel %vm14_vm2, %v403_v31, %v316_v32  ;;  %s436_s26 = smov 16   ;;  %s4_s27 = smov 12  ;;  %v3_v40 = vld [vmem:[%s736_s0] ss:$16 sm:%s2_s25]  }
  0x26   :  { %v333_v36 = vsel %vm6_vm0, %v405_v34, %v404_v33  ;;  %v406_v37 = vld [vmem:[%s736_s0 + $0x1] ss:$16 sm:%s335_s19]   ;;  %322 = vrot.lane.b32.xlu1 %v321_v35, %s436_s26  ;;  %s8_s28 = smov 48  ;;  %s12_s2 = smov 192 }
  0x27   :  { %v407_v38 = vld [vmem:[%s736_s0 + $0x1] ss:$16 sm:%s340_s20]   ;;  %v338_v39 = vsel %vm10_vm1, %v406_v37, %v333_v36  ;;  %v5_v42 = vld [vmem:[%s736_s0] ss:$16 sm:%s4_s27]   ;;  %s437_s7 = smov 8  }
  0x28   :  { %v343_v41 = vsel %vm14_vm2, %v407_v38, %v338_v39  ;;  %v9_v43 = vld [vmem:[%s736_s0] ss:$16 sm:%s8_s28]   ;;  %v7_v44 = vsel %vm6_vm0, %v5_v42, %v3_v40  ;;  %vm302_vm0 = vcmask 261312  }
  0x29   :  { %344 = vrot.lane.b32.xlu0 %v343_v41, %s437_s7  ;;  %v13_v45 = vld [vmem:[%s736_s0] ss:$16 sm:%s12_s2]   ;;  %v11_v46 = vsel %vm10_vm1, %v9_v43, %v7_v44  ;;  %vm324_vm1 = vcmask 195712  }
  0x2a   :  { %v15_v47 = vsel %vm14_vm2, %v13_v45, %v11_v46  ;;  %vm346_vm2 = vcmask 130112  }
  0x2b   :  { %17 = vst.msk [vmem:[%s737_s1] sm:$0xff] %vm16_vm3, %v15_v47  }
  0x78   :  { %v37_v48 = vpop.permute.xlu0 %36  }
  0x79   :  { %39 = vst.msk [vmem:[%s737_s1] sm:$0xff] %vm38_vm4, %v37_v48  }
  0x7a   :  { %v81_v49 = vpop.permute.xlu1 %80  }
  0x7d   :  { %v59_v50 = vpop.permute.xlu0 %58  }
  0x7e   :  { %61 = vst.msk [vmem:[%s737_s1] sm:$0xff] %vm60_vm5, %v59_v50  }
  0x7f   :  { %83 = vst.msk [vmem:[%s737_s1] sm:$0xff] %vm82_vm6, %v81_v49   ;;  %v103_v51 = vpop.permute.xlu1 %102  }
  0x80   :  { %105 = vst.msk [vmem:[%s737_s1] sm:$0xff] %vm104_vm7, %v103_v51  }
  0x82   :  { %v125_v52 = vpop.permute.xlu0 %124  }
  0x83   :  { %127 = vst.msk [vmem:[%s737_s1] sm:$0xff] %vm126_vm8, %v125_v52  }
  0x84   :  { %v147_v53 = vpop.permute.xlu1 %146  }
  0x85   :  { %149 = vst.msk [vmem:[%s737_s1] sm:$0xff] %vm148_vm9, %v147_v53  }
  0x87   :  { %v169_v54 = vpop.permute.xlu0 %168  }
  0x88   :  { %171 = vst.msk [vmem:[%s737_s1] sm:$0xff] %vm170_vm10, %v169_v54  }
  0x89   :  { %v191_v55 = vpop.permute.xlu1 %190  }
  0x8a   :  { %193 = vst.msk [vmem:[%s737_s1] sm:$0xff] %vm192_vm11, %v191_v55  }
  0x8c   :  { %v213_v56 = vpop.permute.xlu0 %212  }
  0x8d   :  { %215 = vst.msk [vmem:[%s737_s1] sm:$0xff] %vm214_vm12, %v213_v56  }
  0x8e   :  { %v235_v57 = vpop.permute.xlu1 %234  }
  0x8f   :  { %237 = vst.msk [vmem:[%s737_s1] sm:$0xff] %vm236_vm13, %v235_v57  }
  0x91   :  { %v257_v58 = vpop.permute.xlu0 %256  }
  0x92   :  { %259 = vst.msk [vmem:[%s737_s1] sm:$0xff] %vm258_vm14, %v257_v58  }
  0x93   :  { %v279_v59 = vpop.permute.xlu1 %278  }
  0x94   :  { %281 = vst.msk [vmem:[%s737_s1] sm:$0xff] %vm280_vm15, %v279_v59  }
  0x96   :  { %v301_v60 = vpop.permute.xlu0 %300  }
  0x97   :  { %303 = vst.msk [vmem:[%s737_s1] sm:$0xff] %vm302_vm0, %v301_v60  }
  0x98   :  { %v323_v61 = vpop.permute.xlu1 %322  }
  0x99   :  { %325 = vst.msk [vmem:[%s737_s1] sm:$0xff] %vm324_vm1, %v323_v61  }
  0x9b   :  { %v345_v62 = vpop.permute.xlu0 %344  }
  0x9c   :  { %347 = vst.msk [vmem:[%s737_s1] sm:$0xff] %vm346_vm2, %v345_v62  }

// kernel: double_conv.1
= control target key start
LH: loop header
LB: loop body
LE: loop exit
PB: predicated region body
PF: predicated region fallthrough
CT: control target
= control target key end

     0   :  { %vm86_vm0 = vcmask 523264   ;;  %v2042_v31 = vmov 0.0|0.0   ;;  %vm2043_vm1 = vmmov 0   ;;  %v2044_v54 = vmov 0.0   ;;  %s2488_s1 = inlined_call_operand.vmem [shape: bf16[3,64,128], index: 1, kind: input, shape index: {}]   ;;  %s2489_s0 = inlined_call_operand.vmem [shape: f32[2,18,64], index: 0, kind: input, shape index: {}]   ;;  %s2490_s7 = inlined_call_operand.vmem [shape: f32[128,8], index: 7, kind: input, shape index: {}]   ;;  %s2491_s8 = inlined_call_operand.vmem [shape: f32[8,128], index: 8, kind: input, shape index: {}]   ;;  %s2492_s2 = inlined_call_operand.vmem [shape: bf16[3,128,128], index: 2, kind: input, shape index: {}]   ;;  %s2493_s3 = inlined_call_operand.vmem [shape: f32[1,8], index: 3, kind: input, shape index: {}]   ;;  %s2494_s4 = inlined_call_operand.vmem [shape: f32[1,8], index: 4, kind: input, shape index: {}]   ;;  %s2495_s5 = inlined_call_operand.vmem [shape: f32[1,8], index: 5, kind: input, shape index: {}]   ;;  %s2496_s6 = inlined_call_operand.vmem [shape: f32[1,8], index: 6, kind: input, shape index: {}]   ;;  %s2497_s9 = inlined_call_operand.vmem [shape: f32[2,16,128], index: 9, kind: output, shape index: {}]  }
   0x1   :  { %v2002_v0 = vld [vmem:[%s2488_s1] sm:$0xff]   ;;  %v2003_v1 = vld [vmem:[%s2488_s1 + $0x8] sm:$0xff]   ;;  %v2004_v2 = vld [vmem:[%s2488_s1 + $0x10] sm:$0xff]   ;;  %677 = vst [vmem:[#allocation2] sm:$0x1] %v2044_v54  ;;  %vm510_vm2 = vcmask 64512  }
   0x2   :  { %1643 = vmatprep.subr.bf16.mxu0 %v2002_v0  ;;  %v2006_v3 = vld [vmem:[%s2488_s1 + $0x20] sm:$0xff]   ;;  %v34_v5 = vld [vmem:[%s2489_s0 + $0x8] sm:$0xff]  ;;  %v2005_v8 = vld [vmem:[%s2488_s1 + $0x18] sm:$0xff]   ;;  %678 = vst [vmem:[#allocation2 + $0x18] sm:$0x1] %v2044_v54 }
   0x3   :  { %1644 = vmatpush3.bf16.msra.mxu0 %v2002_v0  ;;  %v33_v4 = vld [vmem:[%s2489_s0] sm:$0xff]  ;;  %1631 = vmatprep.subr.bf16.mxu1 %v2006_v3  ;;  %v2008_v7 = vld [vmem:[%s2488_s1 + $0x28] sm:$0xff]   ;;  %v35_v9 = vld [vmem:[%s2489_s0 + $0x18] sm:$0xff]  ;;  %679 = vst [vmem:[#allocation2 + $0x11] sm:$0x1] %v2044_v54 }
   0x4   :  { %1645 = vmatprep.subr.bf16.mxu0 %v2003_v1  ;;  %v37_v6 = vpack.c.bf16 %v34_v5, %v33_v4  ;;  %1632 = vmatpush3.bf16.msra.mxu1 %v2006_v3  ;;  %v2007_v10 = vld [vmem:[%s2488_s1 + $0x40] sm:$0xff]   ;;  %v2010_v11 = vld [vmem:[%s2488_s1 + $0x30] sm:$0xff]   ;;  %v2012_v13 = vld [vmem:[%s2488_s1 + $0x38] sm:$0xff]   ;;  %680 = vst [vmem:[#allocation2 + $0x29] sm:$0x1] %v2044_v54 }
   0x5   :  { %1633 = vmatprep.subr.bf16.mxu1 %v2008_v7  ;;  %v36_v12 = vld [vmem:[%s2489_s0 + $0x20] sm:$0xff]  ;;  %v48_v15 = vld [vmem:[%s2489_s0 + $0x9] sm:$0xff]  ;;  %v344_v30 = vld [vmem:[%s2490_s7 + $0x18] sm:$0xff] }
   0x6   :  { %1651 = vmatprep.mubr.msk.bf16.mxu0 %vm86_vm0, %v37_v6  ;;  %v47_v14 = vld [vmem:[%s2489_s0 + $0x1] sm:$0xff]  ;;  %v38_v17 = vpack.c.bf16 %v36_v12, %v35_v9  ;;  %v49_v19 = vld [vmem:[%s2489_s0 + $0x19] sm:$0xff]  ;;  %v222_v21 = vld [vmem:[%s2489_s0 + $0xa] sm:$0xff] }
   0x7   :  { %1646 = vmatpush3.bf16.msra.mxu0 %v2003_v1  ;;  %v51_v16 = vpack.c.bf16 %v48_v15, %v47_v14  ;;  %v221_v18 = vld [vmem:[%s2489_s0 + $0x2] sm:$0xff]  ;;  %v2011_v28 = vld [vmem:[%s2488_s1 + $0x50] sm:$0xff]   ;;  %v2013_v33 = vld [vmem:[%s2488_s1 + $0x58] sm:$0xff]  }
   0x8   :  { %1647 = vmatprep.subr.bf16.mxu0 %v2004_v2  ;;  %1634 = vmatpush3.bf16.msra.mxu1 %v2008_v7  ;;  %v50_v20 = vld [vmem:[%s2489_s0 + $0x21] sm:$0xff]  ;;  %v225_v23 = vpack.c.bf16 %v222_v21, %v221_v18  ;;  %v343_v29 = vld [vmem:[%s2490_s7 + $0x10] sm:$0xff]  ;;  %v348_v41 = vld [vmem:[%s2490_s7 + $0x38] sm:$0xff] }
   0x9   :  { %1635 = vmatprep.subr.bf16.mxu1 %v2010_v11  ;;  %v2009_v22 = vld [vmem:[%s2488_s1 + $0x48] sm:$0xff]   ;;  %v341_v24 = vld [vmem:[%s2490_s7] sm:$0xff]  ;;  %1639 = vmatprep.mubr.msk.bf16.mxu1 %vm86_vm0, %v51_v16  ;;  %v52_v26 = vpack.c.bf16 %v50_v20, %v49_v19  ;;  %v2179_v32 = vpack.c.bf16 %v344_v30, %v343_v29  ;;  %v347_v40 = vld [vmem:[%s2490_s7 + $0x30] sm:$0xff] }
   0xa   :  { %v342_v25 = vld [vmem:[%s2490_s7 + $0x8] sm:$0xff]  ;;  %v223_v34 = vld [vmem:[%s2489_s0 + $0x1a] sm:$0xff]  ;;  %v2210_v42 = vpack.c.bf16 %v348_v41, %v347_v40  ;;  %v351_v46 = vld [vmem:[%s2490_s7 + $0x50] sm:$0xff] }
   0xb   :  { %1648 = vmatpush3.bf16.msra.mxu0 %v2004_v2  ;;  %v2164_v27 = vpack.c.bf16 %v342_v25, %v341_v24  ;;  %v224_v35 = vld [vmem:[%s2489_s0 + $0x22] sm:$0xff]  ;;  %v352_v47 = vld [vmem:[%s2490_s7 + $0x58] sm:$0xff]  ;;  %v355_v52 = vld [vmem:[%s2490_s7 + $0x70] sm:$0xff] }
   0xc   :  { %1649 = vmatprep.subr.bf16.mxu0 %v2005_v8  ;;  %1636 = vmatpush3.bf16.msra.mxu1 %v2010_v11  ;;  %v226_v36 = vpack.c.bf16 %v224_v35, %v223_v34  ;;  %v345_v37 = vld [vmem:[%s2490_s7 + $0x20] sm:$0xff]  ;;  %v346_v38 = vld [vmem:[%s2490_s7 + $0x28] sm:$0xff]  ;;  %v2230_v48 = vpack.c.bf16 %v352_v47, %v351_v46  ;;  %v356_v53 = vld [vmem:[%s2490_s7 + $0x78] sm:$0xff] }
   0xd   :  { %1637 = vmatprep.subr.bf16.mxu1 %v2012_v13  ;;  %v2200_v39 = vpack.c.bf16 %v346_v38, %v345_v37  ;;  %v349_v43 = vld [vmem:[%s2490_s7 + $0x40] sm:$0xff]  ;;  %v350_v44 = vld [vmem:[%s2490_s7 + $0x48] sm:$0xff]  ;;  %v2256_v55 = vpack.c.bf16 %v356_v53, %v355_v52  ;;  %v2016_v53 = vld [vmem:[%s2492_s2 + $0x50] sm:$0xff]  }
   0xe   :  { %v2220_v45 = vpack.c.bf16 %v350_v44, %v349_v43  ;;  %v353_v49 = vld [vmem:[%s2490_s7 + $0x60] sm:$0xff]  ;;  %v354_v50 = vld [vmem:[%s2490_s7 + $0x68] sm:$0xff] }
   0xf   :  { %1650 = vmatpush3.bf16.msra.mxu0 %v2005_v8  ;;  %v2240_v51 = vpack.c.bf16 %v354_v50, %v353_v49  ;;  %v502_v41 = vld [vmem:[%s2493_s3] sm:$0x1]  ;;  %v2015_v52 = vld [vmem:[%s2492_s2 + $0x48] sm:$0xff]  }
  0x10   :  { %1655 = vmatprep.subr.bf16.mxu0 %v2007_v10  ;;  %1638 = vmatpush3.bf16.msra.mxu1 %v2012_v13  ;;  %v2014_v46 = vld [vmem:[%s2492_s2 + $0x40] sm:$0xff]  }
  0x11   :  { %1887 = vmatprep.subr.bf16.mxu1 %v2042_v31  ;;  %v506_v47 = vld [vmem:[%s2494_s4] sm:$0x1] }
  0x12   :  { %1652 = vmatmul.mubr.msk.bf16.vlgmr.msra.gmra.mrb[0].mxu0 %vm86_vm0, %v38_v17 }
  0x13   :  { %1656 = vmatpush3.bf16.msra.mxu0 %v2007_v10  ;;  %1663 = vmatprep.mubr.msk.bf16.mxu0 %vm86_vm0, %v225_v23 }
  0x14   :  { %1657 = vmatprep.subr.bf16.mxu0 %v2009_v22  ;;  %1640 = vmatmul.mubr.msk.bf16.vlgmr.msra.gmra.mrb[0].mxu1 %vm86_vm0, %v52_v26  ;;  %v2322_v26 = vld [vmem:[%s2491_s8] sm:$0xff] }
  0x15   :  { %1889 = vmatpush3.bf16.msra.mxu1 %v2164_v27  ;;  %1699 = vmatprep.mubr.msk.f32.mxu1 %vm2043_vm1, %v2044_v54 }
  0x16   :  { %1890 = vmatprep.subr.bf16.mxu1 %v2042_v31 }
  0x17   :  { %1658 = vmatpush3.bf16.msra.mxu0 %v2009_v22 }
  0x18   :  { %1659 = vmatprep.subr.bf16.mxu0 %v2011_v28 }
  0x19   :  { %1892 = vmatpush3.bf16.msra.mxu1 %v2179_v32 }
  0x1a   :  { %1893 = vmatprep.subr.bf16.mxu1 %v2042_v31 }
  0x1b   :  { %1660 = vmatpush3.bf16.msra.mxu0 %v2011_v28 }
  0x1c   :  { %1661 = vmatprep.subr.bf16.mxu0 %v2013_v33 }
  0x1d   :  { %1895 = vmatpush3.bf16.msra.mxu1 %v2200_v39 }
  0x1e   :  { %1896 = vmatprep.subr.bf16.mxu1 %v2042_v31 }
  0x1f   :  { %1662 = vmatpush3.bf16.msra.mxu0 %v2013_v33 }
  0x20   :  { %1737 = vmatprep.subr.mxu0 %v2044_v54 }
  0x21   :  { %1898 = vmatpush3.bf16.msra.mxu1 %v2210_v42 }
  0x22   :  { %1664 = vmatmul.mubr.msk.bf16.vlgmr.msra.gmra.mrb[0].mxu0 %vm86_vm0, %v226_v36  ;;  %1899 = vmatprep.subr.bf16.mxu1 %v2042_v31 }
  0x23   :  { %1739 = vmatprep.mubr.msk.f32.mxu0 %vm2043_vm1, %v2044_v54  ;;  %1738 = vmatpush3.msra.mxu0 %v2322_v26 }
  0x24   :  { %1742 = vmatprep.subr.mxu0 %v2044_v54 }
  0x25   :  { %1901 = vmatpush3.bf16.msra.mxu1 %v2220_v45 }
  0x26   :  { %1902 = vmatprep.subr.bf16.mxu1 %v2042_v31 }
  0x29   :  { %1904 = vmatpush3.bf16.msra.mxu1 %v2230_v48 }
  0x2a   :  { %1905 = vmatprep.subr.bf16.mxu1 %v2042_v31 }
  0x2d   :  { %1907 = vmatpush3.bf16.msra.mxu1 %v2240_v51 }
  0x2e   :  { %1908 = vmatprep.subr.bf16.mxu1 %v2042_v31 }
  0x31   :  { %1910 = vmatpush3.bf16.msra.mxu1 %v2256_v55 }
  0x32   :  { %1911 = vmatprep.subr.bf16.mxu1 %v2042_v31 }
  0xe7   :  { %v1641_v56 = vpop.f32.mrb[0].mxu1 }
  0xe8   :  { %v127_v57 = vpop.f32.mrb[1].mxu1 }
  0xe9   :  { %v1642_v58 = vpop.f32.mrb[2].mxu1 }
  0xea   :  { %v130_v59 = vpop.f32.mrb[3].mxu1 }
  0xf5   :  { %v1665_v60 = vpop.f32.mrb[0].mxu0 }
  0xf6   :  { %v2263_v61 = vadd.f32 %v1665_v60, %v1641_v56  ;;  %v300_v62 = vpop.f32.mrb[1].mxu0  ;;  %v2017_v56 = vld [vmem:[%s2492_s2 + $0x58] sm:$0xff]  }
  0xf7   :  { %v2265_v63 = vadd.f32 %v300_v62, %v127_v57  ;;  %v1666_v0 = vpop.f32.mrb[2].mxu0  ;;  %v2018_v57 = vld [vmem:[%s2492_s2 + $0x60] sm:$0xff]   ;;  %v2021_v60 = vld [vmem:[%s2492_s2 + $0x78] sm:$0xff]  }
  0xf8   :  { %v2267_v1 = vadd.f32 %v1666_v0, %v1642_v58  ;;  %v303_v2 = vpop.f32.mrb[3].mxu0  ;;  %v330_v16 = vmul.f32 %v2263_v61, %v2263_v61  ;;  %v2019_v58 = vld [vmem:[%s2492_s2 + $0x68] sm:$0xff]   ;;  %v2022_v62 = vld [vmem:[%s2492_s2] sm:$0xff]   ;;  %v657_v0 = vlaneseq }
  0xf9   :  { %v2269_v3 = vadd.f32 %v303_v2, %v130_v59  ;;  %v328_v12 = vmul.f32 %v2265_v63, %v2265_v63  ;;  %v2020_v59 = vld [vmem:[%s2492_s2 + $0x70] sm:$0xff]  }
  0xfa   :  { %v331_v18 = vmul.f32 %v2267_v1, %v2267_v1  ;;  %v658_v2 = vshrl.u32 %v657_v0, 7 }
  0xfb   :  { %v319_v4 = vadd.f32 %v2269_v3, %v2265_v63  ;;  %v329_v10 = vmul.f32 %v2269_v3, %v2269_v3 }
  0xfd   :  { %v320_v5 = vadd.f32 %v2263_v61, %v319_v4  ;;  %v332_v14 = vadd.f32 %v329_v10, %v328_v12  ;;  %v2364_v4 = vsub.s32 0, %v658_v2 }
  0xff   :  { %v321_v6 = vadd.f32 %v2267_v1, %v320_v5  ;;  %v333_v17 = vadd.f32 %v332_v14, %v330_v16 }
 0x101   :  { %v322_v7 = vrot.slane %v321_v6, 4  ;;  %v334_v19 = vadd.f32 %v333_v17, %v331_v18 }
 0x103   :  { %v323_v8 = vadd.f32 %v322_v7, %v321_v6  ;;  %v335_v20 = vrot.slane %v334_v19, 4 }
 0x105   :  { %v324_v9 = vrot.slane %v323_v8, 2  ;;  %v336_v21 = vadd.f32 %v335_v20, %v334_v19 }
 0x107   :  { %v325_v11 = vadd.f32 %v324_v9, %v323_v8  ;;  %v337_v22 = vrot.slane %v336_v21, 2 }
 0x109   :  { %v326_v13 = vrot.slane %v325_v11, 1  ;;  %v338_v23 = vadd.f32 %v337_v22, %v336_v21 }
 0x10b   :  { %v327_v15 = vadd.f32 %v326_v13, %v325_v11  ;;  %v339_v24 = vrot.slane %v338_v23, 1 }
 0x10d   :  { %1700 = vmatmul.mubr.f32.vlgmr.msra.gmra.mrb[4].mxu1 %v327_v15  ;;  %v340_v25 = vadd.f32 %v339_v24, %v338_v23 }
 0x10e   :  { %1913 = vmatpush3.bf16.msra.mxu1 %v2164_v27  ;;  %1734 = vmatprep.mubr.msk.f32.mxu1 %vm2043_vm1, %v2044_v54 }
 0x10f   :  { %1914 = vmatprep.subr.bf16.mxu1 %v2042_v31 }
 0x112   :  { %1916 = vmatpush3.bf16.msra.mxu1 %v2179_v32 }
 0x113   :  { %1917 = vmatprep.subr.bf16.mxu1 %v2042_v31 }
 0x116   :  { %1919 = vmatpush3.bf16.msra.mxu1 %v2200_v39 }
 0x117   :  { %1920 = vmatprep.subr.bf16.mxu1 %v2042_v31 }
 0x11a   :  { %1922 = vmatpush3.bf16.msra.mxu1 %v2210_v42 }
 0x11b   :  { %1923 = vmatprep.subr.bf16.mxu1 %v2042_v31 }
 0x11e   :  { %1925 = vmatpush3.bf16.msra.mxu1 %v2220_v45 }
 0x11f   :  { %1926 = vmatprep.subr.bf16.mxu1 %v2042_v31 }
 0x122   :  { %1928 = vmatpush3.bf16.msra.mxu1 %v2230_v48 }
 0x123   :  { %1929 = vmatprep.subr.bf16.mxu1 %v2042_v31 }
 0x126   :  { %1931 = vmatpush3.bf16.msra.mxu1 %v2240_v51 }
 0x127   :  { %1932 = vmatprep.subr.bf16.mxu1 %v2042_v31 }
 0x12a   :  { %1934 = vmatpush3.bf16.msra.mxu1 %v2256_v55 }
 0x12b   :  { %1935 = vmatprep.subr.bf16.mxu1 %v2042_v31 }
 0x12d   :  { %1735 = vmatmul.mubr.f32.vlgmr.msra.gmra.mrb[6].mxu1 %v340_v25 }
 0x12e   :  { %1937 = vmatpush3.bf16.msra.mxu1 %v2164_v27  ;;  %1839 = vmatprep.mubr.msk.f32.mxu1 %vm2043_vm1, %v2044_v54 }
 0x12f   :  { %1938 = vmatprep.subr.bf16.mxu1 %v2042_v31 }
 0x132   :  { %1940 = vmatpush3.bf16.msra.mxu1 %v2179_v32 }
 0x133   :  { %1941 = vmatprep.subr.bf16.mxu1 %v2042_v31 }
 0x136   :  { %1943 = vmatpush3.bf16.msra.mxu1 %v2200_v39 }
 0x137   :  { %1944 = vmatprep.subr.bf16.mxu1 %v2042_v31 }
 0x13a   :  { %1946 = vmatpush3.bf16.msra.mxu1 %v2210_v42 }
 0x13b   :  { %1947 = vmatprep.subr.bf16.mxu1 %v2042_v31 }
 0x13e   :  { %1949 = vmatpush3.bf16.msra.mxu1 %v2220_v45 }
 0x13f   :  { %1950 = vmatprep.subr.bf16.mxu1 %v2042_v31 }
 0x142   :  { %1952 = vmatpush3.bf16.msra.mxu1 %v2230_v48 }
 0x143   :  { %1953 = vmatprep.subr.bf16.mxu1 %v2042_v31 }
 0x146   :  { %1955 = vmatpush3.bf16.msra.mxu1 %v2240_v51 }
 0x147   :  { %1956 = vmatprep.subr.bf16.mxu1 %v2042_v31 }
 0x14a   :  { %1958 = vmatpush3.bf16.msra.mxu1 %v2256_v55 }
 0x14b   :  { %1959 = vmatprep.subr.bf16.mxu1 %v2042_v31 }
 0x1e0   :  { %v423_v28 = vpop.f32.mrb[4].mxu1 }
 0x1e1   :  { %v1701_v29 = vpop.f32.mrb[5].mxu1  ;;  %v497_v30 = vmul.f32 0.001953125, %v423_v28  ;;  %v2025_v28 = vld [vmem:[%s2492_s2 + $0x18] sm:$0xff]  }
 0x1e2   :  { %v2026_v29 = vld [vmem:[%s2492_s2 + $0x20] sm:$0xff]  }
 0x1e3   :  { %v499_v34 = vmul.f32 %v497_v30, %v497_v30 }
 0x200   :  { %v493_v33 = vpop.f32.mrb[6].mxu1 }
 0x201   :  { %v498_v35 = vmul.f32 0.001953125, %v493_v33  ;;  %v1736_v36 = vpop.f32.mrb[7].mxu1  ;;  %v2028_v33 = vld [vmem:[%s2492_s2 + $0x30] sm:$0xff]  }
 0x203   :  { %v500_v37 = vsub.f32 %v498_v35, %v499_v34  ;;  %v2029_v34 = vld [vmem:[%s2492_s2 + $0x38] sm:$0xff]   ;;  %v2030_v35 = vld [vmem:[%s2492_s2 + $0x80] sm:$0xff]  }
 0x205   :  { %v501_v38 = vmax.f32 %v500_v37, 0.0 }
 0x207   :  { %v503_v40 = vadd.f32 1e-05, %v501_v38 }
 0x209   :  { %2038 = vrsqrt.f32 %v503_v40 }
 0x213   :  { %v2039_v43 = vpop.eup %2038 }
 0x214   :  { %v505_v44 = vmul.f32 %v2039_v43, %v502_v41  ;;  %v2031_v43 = vld [vmem:[%s2492_s2 + $0x88] sm:$0xff]  }
 0x216   :  { %1740 = vmatmul.mubr.msk.f32.vlgmr.msra.gmra.mrb[4].mxu0 %vm510_vm2, %v505_v44  ;;  %v507_v49 = vmul.f32 %v505_v44, %v497_v30  ;;  %v2027_v30 = vld [vmem:[%s2492_s2 + $0x28] sm:$0xff]  }
 0x217   :  { %1743 = vmatpush3.msra.mxu0 %v2322_v26  ;;  %1744 = vmatprep.mubr.msk.f32.mxu0 %vm2043_vm1, %v2044_v54 }
 0x218   :  { %v508_v50 = vsub.f32 %v506_v47, %v507_v49  ;;  %1747 = vmatprep.subr.bf16.mxu0 %v2014_v46  ;;  %v2033_v47 = vld [vmem:[%s2492_s2 + $0x98] sm:$0xff]   ;;  %v2034_v49 = vld [vmem:[%s2492_s2 + $0xa0] sm:$0xff]  }
 0x21a   :  { %1745 = vmatmul.mubr.msk.f32.vlgmr.msra.gmra.mrb[6].mxu0 %vm510_vm2, %v508_v50  ;;  %v2035_v50 = vld [vmem:[%s2492_s2 + $0xa8] sm:$0xff]  }
 0x21b   :  { %1748 = vmatpush3.bf16.msra.mxu0 %v2014_v46  ;;  %v2032_v46 = vld [vmem:[%s2492_s2 + $0x90] sm:$0xff]  }
 0x21c   :  { %1749 = vmatprep.subr.bf16.mxu0 %v2015_v52 }
 0x21f   :  { %1750 = vmatpush3.bf16.msra.mxu0 %v2015_v52  ;;  %v2036_v52 = vld [vmem:[%s2492_s2 + $0xb0] sm:$0xff]  }
 0x220   :  { %1751 = vmatprep.subr.bf16.mxu0 %v2016_v53 }
 0x223   :  { %1752 = vmatpush3.bf16.msra.mxu0 %v2016_v53  ;;  %v2037_v53 = vld [vmem:[%s2492_s2 + $0xb8] sm:$0xff]  }
 0x224   :  { %1753 = vmatprep.subr.bf16.mxu0 %v2017_v56 }
 0x227   :  { %1754 = vmatpush3.bf16.msra.mxu0 %v2017_v56 }
 0x228   :  { %1755 = vmatprep.subr.bf16.mxu0 %v2018_v57 }
 0x22b   :  { %1756 = vmatpush3.bf16.msra.mxu0 %v2018_v57 }
 0x22c   :  { %1757 = vmatprep.subr.bf16.mxu0 %v2019_v58 }
 0x22f   :  { %1758 = vmatpush3.bf16.msra.mxu0 %v2019_v58 }
 0x230   :  { %1759 = vmatprep.subr.bf16.mxu0 %v2020_v59 }
 0x233   :  { %1760 = vmatpush3.bf16.msra.mxu0 %v2020_v59 }
 0x234   :  { %1761 = vmatprep.subr.bf16.mxu0 %v2021_v60 }
 0x237   :  { %1762 = vmatpush3.bf16.msra.mxu0 %v2021_v60 }
 0x238   :  { %1767 = vmatprep.subr.bf16.mxu0 %v2022_v62 }
 0x2e9   :  { %v580_v5 = vpop.f32.mrb[4].mxu0 }
 0x2ea   :  { %v660_v6 = vrot.slane %v580_v5, %v2364_v4  ;;  %v1741_v7 = vpop.f32.mrb[5].mxu0 }
 0x2ec   :  { %v661_v8 = vmul.f32 %v2265_v63, %v660_v6  ;;  %v662_v10 = vmul.f32 %v2269_v3, %v660_v6  ;;  %v663_v11 = vmul.f32 %v2263_v61, %v660_v6  ;;  %v664_v12 = vmul.f32 %v2267_v1, %v660_v6  ;;  %v2023_v61 = vld [vmem:[%s2492_s2 + $0x8] sm:$0xff]   ;;  %v2024_v1 = vld [vmem:[%s2492_s2 + $0x10] sm:$0xff]  }
 0x2ed   :  { %v653_v9 = vpop.f32.mrb[6].mxu0 }
 0x2ee   :  { %v668_v13 = vrot.slane %v653_v9, %v2364_v4  ;;  %v1746_v14 = vpop.f32.mrb[7].mxu0 }
 0x2f0   :  { %v669_v15 = vadd.f32 %v668_v13, %v661_v8  ;;  %v670_v16 = vadd.f32 %v668_v13, %v662_v10  ;;  %v671_v17 = vadd.f32 %v668_v13, %v663_v11  ;;  %v672_v18 = vadd.f32 %v668_v13, %v664_v12 }
 0x2f2   :  { %v673_v19 = vmax.f32 %v669_v15, 0.0  ;;  %v674_v20 = vmax.f32 %v670_v16, 0.0  ;;  %v675_v21 = vmax.f32 %v671_v17, 0.0  ;;  %v676_v22 = vmax.f32 %v672_v18, 0.0 }
 0x2f4   :  { %681 = vst [vmem:[#allocation2 + $0x1] sm:$0xff] %v673_v19  ;;  %682 = vst [vmem:[#allocation2 + $0x9] sm:$0xff] %v674_v20  ;;  %v711_v63 = vpack.c.bf16 %v674_v20, %v673_v19  ;;  %v712_v3 = vpack.c.bf16 %v676_v22, %v675_v21 }
 0x2f5   :  { %683 = vst [vmem:[#allocation2 + $0x19] sm:$0xff] %v675_v21  ;;  %684 = vst [vmem:[#allocation2 + $0x21] sm:$0xff] %v676_v22 }
 0x2f6   :  { %1763 = vmatprep.mubr.bf16.mxu0 %v711_v63 }
 0x2f7   :  { %1764 = vmatmul.mubr.bf16.vlgmr.msra.gmra.mrb[8].mxu0 %v712_v3 }
 0x2f8   :  { %1768 = vmatpush3.bf16.msra.mxu0 %v2022_v62 }
 0x2f9   :  { %1769 = vmatprep.subr.bf16.mxu0 %v2023_v61 }
 0x2fb   :  { %v685_v23 = vld [vmem:[#allocation2] sm:$0xff]  ;;  %v686_v24 = vld [vmem:[#allocation2 + $0x8] sm:$0xff] }
 0x2fc   :  { %v689_v25 = vpack.c.bf16 %v686_v24, %v685_v23  ;;  %1770 = vmatpush3.bf16.msra.mxu0 %v2023_v61  ;;  %v687_v36 = vld [vmem:[#allocation2 + $0x18] sm:$0xff]  ;;  %v688_v37 = vld [vmem:[#allocation2 + $0x20] sm:$0xff]  ;;  %v925_v40 = vld [vmem:[#allocation2 + $0xa] sm:$0xff] }
 0x2fd   :  { %1771 = vmatprep.subr.bf16.mxu0 %v2024_v1  ;;  %v924_v38 = vld [vmem:[#allocation2 + $0x2] sm:$0xff]  ;;  %v690_v41 = vpack.c.bf16 %v688_v37, %v687_v36  ;;  %v926_v56 = vld [vmem:[#allocation2 + $0x1a] sm:$0xff] }
 0x2fe   :  { %1783 = vmatprep.mubr.bf16.mxu0 %v689_v25  ;;  %v928_v44 = vpack.c.bf16 %v925_v40, %v924_v38  ;;  %v927_v57 = vld [vmem:[#allocation2 + $0x22] sm:$0xff] }
 0x2ff   :  { %v929_v58 = vpack.c.bf16 %v927_v57, %v926_v56 }
 0x300   :  { %1772 = vmatpush3.bf16.msra.mxu0 %v2024_v1 }
 0x301   :  { %1773 = vmatprep.subr.bf16.mxu0 %v2025_v28 }
 0x304   :  { %1774 = vmatpush3.bf16.msra.mxu0 %v2025_v28 }
 0x305   :  { %1775 = vmatprep.subr.bf16.mxu0 %v2026_v29 }
 0x308   :  { %1776 = vmatpush3.bf16.msra.mxu0 %v2026_v29 }
 0x309   :  { %1777 = vmatprep.subr.bf16.mxu0 %v2027_v30 }
 0x30c   :  { %1778 = vmatpush3.bf16.msra.mxu0 %v2027_v30 }
 0x30d   :  { %1779 = vmatprep.subr.bf16.mxu0 %v2028_v33 }
 0x310   :  { %1780 = vmatpush3.bf16.msra.mxu0 %v2028_v33 }
 0x311   :  { %1781 = vmatprep.subr.bf16.mxu0 %v2029_v34 }
 0x314   :  { %1782 = vmatpush3.bf16.msra.mxu0 %v2029_v34 }
 0x315   :  { %1787 = vmatprep.subr.bf16.mxu0 %v2030_v35 }
 0x317   :  { %1784 = vmatmul.mubr.bf16.vlgmr.msra.gmra.mrb[8].mxu0 %v690_v41 }
 0x318   :  { %1788 = vmatpush3.bf16.msra.mxu0 %v2030_v35  ;;  %1803 = vmatprep.mubr.bf16.mxu0 %v928_v44 }
 0x319   :  { %1789 = vmatprep.subr.bf16.mxu0 %v2031_v43 }
 0x31c   :  { %1790 = vmatpush3.bf16.msra.mxu0 %v2031_v43 }
 0x31d   :  { %1791 = vmatprep.subr.bf16.mxu0 %v2032_v46 }
 0x320   :  { %1792 = vmatpush3.bf16.msra.mxu0 %v2032_v46 }
 0x321   :  { %1793 = vmatprep.subr.bf16.mxu0 %v2033_v47 }
 0x324   :  { %1794 = vmatpush3.bf16.msra.mxu0 %v2033_v47 }
 0x325   :  { %1795 = vmatprep.subr.bf16.mxu0 %v2034_v49 }
 0x328   :  { %1796 = vmatpush3.bf16.msra.mxu0 %v2034_v49 }
 0x329   :  { %1797 = vmatprep.subr.bf16.mxu0 %v2035_v50 }
 0x32c   :  { %1798 = vmatpush3.bf16.msra.mxu0 %v2035_v50 }
 0x32d   :  { %1799 = vmatprep.subr.bf16.mxu0 %v2036_v52 }
 0x330   :  { %1800 = vmatpush3.bf16.msra.mxu0 %v2036_v52 }
 0x331   :  { %1801 = vmatprep.subr.bf16.mxu0 %v2037_v53 }
 0x334   :  { %1802 = vmatpush3.bf16.msra.mxu0 %v2037_v53 }
 0x335   :  { %1877 = vmatprep.subr.mxu0 %v2044_v54 }
 0x337   :  { %1804 = vmatmul.mubr.bf16.vlgmr.msra.gmra.mrb[8].mxu0 %v929_v58 }
 0x338   :  { %1878 = vmatpush3.msra.mxu0 %v2322_v26  ;;  %1879 = vmatprep.mubr.msk.f32.mxu0 %vm2043_vm1, %v2044_v54 }
 0x40a   :  { %v2421_v59 = vpop.f32.mrb[8].mxu0 }
 0x40b   :  { %v2423_v60 = vpop.f32.mrb[9].mxu0  ;;  %v1059_v7 = vmul.f32 %v2421_v59, %v2421_v59 }
 0x40c   :  { %v2425_v62 = vpop.f32.mrb[10].mxu0  ;;  %v1057_v2 = vmul.f32 %v2423_v60, %v2423_v60 }
 0x40d   :  { %v2427_v0 = vpop.f32.mrb[11].mxu0  ;;  %v1060_v10 = vmul.f32 %v2425_v62, %v2425_v62 }
 0x40e   :  { %v1048_v5 = vadd.f32 %v2427_v0, %v2423_v60  ;;  %v1058_v6 = vmul.f32 %v2427_v0, %v2427_v0 }
 0x410   :  { %v1049_v8 = vadd.f32 %v2421_v59, %v1048_v5  ;;  %v1061_v9 = vadd.f32 %v1058_v6, %v1057_v2 }
 0x412   :  { %v1050_v11 = vadd.f32 %v2425_v62, %v1049_v8  ;;  %v1062_v12 = vadd.f32 %v1061_v9, %v1059_v7 }
 0x414   :  { %v1051_v13 = vrot.slane %v1050_v11, 4  ;;  %v1063_v14 = vadd.f32 %v1062_v12, %v1060_v10 }
 0x416   :  { %v1052_v15 = vadd.f32 %v1051_v13, %v1050_v11  ;;  %v1064_v20 = vrot.slane %v1063_v14, 4 }
 0x418   :  { %v1053_v16 = vrot.slane %v1052_v15, 2  ;;  %v1065_v21 = vadd.f32 %v1064_v20, %v1063_v14 }
 0x41a   :  { %v1054_v17 = vadd.f32 %v1053_v16, %v1052_v15 }
 0x41c   :  { %v1055_v18 = vrot.slane %v1054_v17, 1 }
 0x41e   :  { %v1056_v19 = vadd.f32 %v1055_v18, %v1054_v17 }
 0x420   :  { %1840 = vmatmul.mubr.f32.vlgmr.msra.gmra.mrb[8].mxu1 %v1056_v19 }
 0x421   :  { %1961 = vmatpush3.bf16.msra.mxu1 %v2164_v27  ;;  %1874 = vmatprep.mubr.msk.f32.mxu1 %vm2043_vm1, %v2044_v54  ;;  %v1066_v27 = vrot.slane %v1065_v21, 2 }
 0x422   :  { %1962 = vmatprep.subr.bf16.mxu1 %v2042_v31 }
 0x425   :  { %1964 = vmatpush3.bf16.msra.mxu1 %v2179_v32  ;;  %v1067_v32 = vadd.f32 %v1066_v27, %v1065_v21 }
 0x426   :  { %1965 = vmatprep.subr.bf16.mxu1 %v2042_v31 }
 0x429   :  { %1967 = vmatpush3.bf16.msra.mxu1 %v2200_v39  ;;  %v1068_v39 = vrot.slane %v1067_v32, 1 }
 0x42a   :  { %1968 = vmatprep.subr.bf16.mxu1 %v2042_v31 }
 0x42d   :  { %1970 = vmatpush3.bf16.msra.mxu1 %v2210_v42  ;;  %v1069_v42 = vadd.f32 %v1068_v39, %v1067_v32 }
 0x42e   :  { %1971 = vmatprep.subr.bf16.mxu1 %v2042_v31 }
 0x431   :  { %1973 = vmatpush3.bf16.msra.mxu1 %v2220_v45 }
 0x432   :  { %1974 = vmatprep.subr.bf16.mxu1 %v2042_v31 }
 0x435   :  { %1976 = vmatpush3.bf16.msra.mxu1 %v2230_v48 }
 0x436   :  { %1977 = vmatprep.subr.bf16.mxu1 %v2042_v31 }
 0x439   :  { %1979 = vmatpush3.bf16.msra.mxu1 %v2240_v51 }
 0x43a   :  { %1980 = vmatprep.subr.bf16.mxu1 %v2042_v31 }
 0x43d   :  { %1982 = vmatpush3.bf16.msra.mxu1 %v2256_v55  ;;  %v1231_v55 = vld [vmem:[%s2495_s5] sm:$0x1] }
 0x43e   :  { %1882 = vmatprep.subr.mxu1 %v2044_v54 }
 0x440   :  { %1875 = vmatmul.mubr.f32.vlgmr.msra.gmra.mrb[10].mxu1 %v1069_v42 }
 0x441   :  { %1883 = vmatpush3.msra.mxu1 %v2322_v26  ;;  %1884 = vmatprep.mubr.msk.f32.mxu1 %vm2043_vm1, %v2044_v54  ;;  %v1235_v54 = vld [vmem:[%s2496_s6] sm:$0x1] }
 0x4f3   :  { %v1152_v45 = vpop.f32.mrb[8].mxu1 }
 0x4f4   :  { %v1841_v48 = vpop.f32.mrb[9].mxu1  ;;  %v1226_v22 = vmul.f32 0.001953125, %v1152_v45 }
 0x4f6   :  { %v1228_v3 = vmul.f32 %v1226_v22, %v1226_v22 }
 0x513   :  { %v1222_v63 = vpop.f32.mrb[10].mxu1 }
 0x514   :  { %v1227_v51 = vmul.f32 0.001953125, %v1222_v63  ;;  %v1876_v61 = vpop.f32.mrb[11].mxu1 }
 0x516   :  { %v1229_v31 = vsub.f32 %v1227_v51, %v1228_v3 }
 0x518   :  { %v1230_v1 = vmax.f32 %v1229_v31, 0.0 }
 0x51a   :  { %v1232_v23 = vadd.f32 1e-05, %v1230_v1 }
 0x51c   :  { %2040 = vrsqrt.f32 %v1232_v23 }
 0x526   :  { %v2041_v24 = vpop.eup %2040 }
 0x527   :  { %v1234_v26 = vmul.f32 %v2041_v24, %v1231_v55 }
 0x529   :  { %1880 = vmatmul.mubr.msk.f32.vlgmr.msra.gmra.mrb[12].mxu0 %vm510_vm2, %v1234_v26  ;;  %v1236_v25 = vmul.f32 %v1234_v26, %v1226_v22 }
 0x52b   :  { %v1237_v28 = vsub.f32 %v1235_v54, %v1236_v25 }
 0x52d   :  { %1885 = vmatmul.mubr.msk.f32.vlgmr.msra.gmra.mrb[12].mxu1 %vm510_vm2, %v1237_v28 }
 0x5fc   :  { %v1308_v29 = vpop.f32.mrb[12].mxu0 }
 0x5fd   :  { %v1388_v30 = vrot.slane %v1308_v29, %v2364_v4  ;;  %v1881_v33 = vpop.f32.mrb[13].mxu0 }
 0x5ff   :  { %v1389_v34 = vmul.f32 %v1388_v30, %v2423_v60  ;;  %v1390_v35 = vmul.f32 %v1388_v30, %v2427_v0  ;;  %v1391_v36 = vmul.f32 %v2421_v59, %v1388_v30  ;;  %v1392_v37 = vmul.f32 %v2425_v62, %v1388_v30 }
 0x600   :  { %v1381_v38 = vpop.f32.mrb[12].mxu1 }
 0x601   :  { %v1396_v40 = vrot.slane %v1381_v38, %v2364_v4  ;;  %v1886_v41 = vpop.f32.mrb[13].mxu1 }
 0x603   :  { %v1397_v43 = vadd.f32 %v1396_v40, %v1389_v34  ;;  %v1398_v44 = vadd.f32 %v1396_v40, %v1390_v35  ;;  %v1399_v46 = vadd.f32 %v1396_v40, %v1391_v36  ;;  %v1400_v47 = vadd.f32 %v1396_v40, %v1392_v37 }
 0x605   :  { %v1401_v49 = vmax.f32 %v1397_v43, 0.0  ;;  %v1402_v50 = vmax.f32 %v1398_v44, 0.0  ;;  %v1403_v52 = vmax.f32 %v1399_v46, 0.0  ;;  %v1404_v53 = vmax.f32 %v1400_v47, 0.0 }
 0x607   :  { %1405 = vst [vmem:[%s2497_s9] sm:$0xff] %v1401_v49  ;;  %1406 = vst [vmem:[%s2497_s9 + $0x8] sm:$0xff] %v1402_v50 }
 0x608   :  { %1407 = vst [vmem:[%s2497_s9 + $0x10] sm:$0xff] %v1403_v52  ;;  %1408 = vst [vmem:[%s2497_s9 + $0x18] sm:$0xff] %v1404_v53 }

</bundles_post_ra>
